<compile_context>
chip_gen: v7x
topology: tpu7x:2x2x1
jax: 0.10.0
libtpu: 0.0.40
codegen_flags: <defaults>
</compile_context>

<pallas_src>
import functools

import jax
import jax.numpy as jnp
import numpy as np
from jax import lax
from jax.experimental import pallas as pl
from jax.experimental.pallas import tpu as pltpu

_NEG_INF = -1e30            # finite "minus infinity" for masking padded vocab lanes
_LANE = 128
_SUBLANE = 8
_VMEM_TABLE_LIMIT_BYTES = 8 * 1024 * 1024   # budget for the bf16 split table in VMEM


def _round_up(x, m):
    return ((x + m - 1) // m) * m


def _split_table_bf16(table_p):
    """Split a padded f32 table into three bf16 planes (lo, mid, hi).

    one_hot @ lo + one_hot @ mid + one_hot @ hi reconstructs the gathered f32
    rows to within 1 ulp, independent of the MXU's default f32 precision.
    """
    t_hi = table_p.astype(jnp.bfloat16)
    r1 = table_p - t_hi.astype(jnp.float32)
    t_mid = r1.astype(jnp.bfloat16)
    t_lo = (r1 - t_mid.astype(jnp.float32)).astype(jnp.bfloat16)
    return jnp.stack([t_lo, t_mid, t_hi])          # (3, Kp, Vp) bf16


def _gather_rows(idx_col, table3_ref):
    """Embedding row gather as one-hot MXU matmuls. Returns (TM, Vp) f32."""
    tm = idx_col.shape[0]
    kp = table3_ref.shape[1]
    k_iota = lax.broadcasted_iota(jnp.int32, (tm, kp), 1)
    one_hot = jnp.where(k_iota == idx_col, 1.0, 0.0).astype(jnp.bfloat16)  # (TM, Kp)
    out = jnp.dot(one_hot, table3_ref[0], preferred_element_type=jnp.float32)
    out = out + jnp.dot(one_hot, table3_ref[1], preferred_element_type=jnp.float32)
    out = out + jnp.dot(one_hot, table3_ref[2], preferred_element_type=jnp.float32)
    return out


def _logits_kernel(idx_ref, table3_ref, logits_ref):
    # Inference path: gather rows, lane-dense store, nothing else.
    logits_ref[...] = _gather_rows(idx_ref[...], table3_ref)


def _loss_kernel(idx_ref, tgt_ref, table3_ref, logits_ref, loss_ref,
                 *, vocab_size, n_valid, tokens_per_tile):
    tm, vp = logits_ref.shape
    logits = _gather_rows(idx_ref[...], table3_ref)           # (TM, Vp) f32
    logits_ref[...] = logits                                   # lane-dense store

    # Cross-entropy in f32; padded vocab lanes masked out of max/logsumexp.
    cols = lax.broadcasted_iota(jnp.int32, (tm, vp), 1)
    masked = jnp.where(cols < vocab_size, logits, _NEG_INF)
    m = jnp.max(masked, axis=-1, keepdims=True)
    lse = jnp.log(jnp.sum(jnp.exp(masked - m), axis=-1, keepdims=True)) + m
    tgt_logit = jnp.sum(jnp.where(cols == tgt_ref[...], logits, 0.0),
                        axis=-1, keepdims=True)                # (TM, 1)

    rows = (pl.program_id(0) * tokens_per_tile
            + lax.broadcasted_iota(jnp.int32, (tm, 1), 0))
    valid = (rows < n_valid).astype(jnp.float32)               # padded tokens -> 0
    loss_ref[...] = valid * (lse - tgt_logit)                  # per-row partial CE


def _bigram_pallas(idx_flat, tgt_flat, table, *, tokens_per_tile=1024):
    """idx_flat: (N,) int; tgt_flat: (N,) int or None; table: (V, V) f32.

    Returns ((N_pad, Vp) lane-padded f32 logits, scalar loss or None).
    """
    n = int(idx_flat.shape[0])
    v = int(table.shape[0])

    kp = _round_up(v, _LANE)        # table-row (contraction) dim
    vp = _round_up(v, _LANE)        # lane-dense vocab dim
    if 3 * kp * vp * 2 > _VMEM_TABLE_LIMIT_BYTES:
        # TODO(synk): large-vocab fallback (HBM row-DMA gather with a bounded
        # semaphore ring + vocab-axis grid with online logsumexp) not wired up.
        raise NotImplementedError("vocabulary too large for the VMEM-resident table path")

    tm = _round_up(min(int(tokens_per_tile), _round_up(n, _SUBLANE)), _SUBLANE)
    n_pad = _round_up(n, tm)
    num_tiles = n_pad // tm

    # NOTE: pad + bf16 split are tiny (V x V) ops, but a real model should
    # hoist them to init instead of paying them on every forward call.
    table_p = jnp.pad(table.astype(jnp.float32), ((0, kp - v), (0, vp - v)))
    table3 = _split_table_bf16(table_p)                         # (3, Kp, Vp) bf16
    idx_p = jnp.pad(idx_flat.astype(jnp.int32), (0, n_pad - n)).reshape(n_pad, 1)

    tok_spec = pl.BlockSpec((tm, 1), lambda i: (i, 0))
    table_spec = pl.BlockSpec((3, kp, vp), lambda i: (0, 0, 0))  # VMEM-resident
    logits_spec = pl.BlockSpec((tm, vp), lambda i: (i, 0))
    cparams = pltpu.CompilerParams(
        dimension_semantics=("parallel",),      # no cross-tile state -> 2 TCs on v7x
        vmem_limit_bytes=64 * 1024 * 1024,
    )

    if tgt_flat is None:
        logits_p = pl.pallas_call(
            _logits_kernel,
            out_shape=jax.ShapeDtypeStruct((n_pad, vp), jnp.float32),
            grid=(num_tiles,),
            in_specs=[tok_spec, table_spec],
            out_specs=logits_spec,
            compiler_params=cparams,
        )(idx_p, table3)
        return logits_p, None

    tgt_p = jnp.pad(tgt_flat.astype(jnp.int32), (0, n_pad - n)).reshape(n_pad, 1)
    kernel = functools.partial(_loss_kernel, vocab_size=v, n_valid=n,
                               tokens_per_tile=tm)
    logits_p, loss_rows = pl.pallas_call(
        kernel,
        out_shape=(jax.ShapeDtypeStruct((n_pad, vp), jnp.float32),
                   jax.ShapeDtypeStruct((n_pad, 1), jnp.float32)),
        grid=(num_tiles,),
        in_specs=[tok_spec, tok_spec, table_spec],
        out_specs=(logits_spec, pl.BlockSpec((tm, 1), lambda i: (i, 0))),
        compiler_params=cparams,
    )(idx_p, tgt_p, table3)
    loss = jnp.sum(loss_rows) * jnp.float32(1.0 / n)   # invalid rows are exact zeros
    return logits_p, loss


def bigram_forward(idx, targets, table, *, tokens_per_tile=1024):
    """Mirrors BigramLanguageModel.forward.

    idx: (B, T) int; targets: (B, T) int or None; table: (V, V) f32.
    Returns ((B*T, V) logits, loss) with targets, ((B, T, V) logits, None) else.
    """
    B, T = idx.shape
    V = int(table.shape[0])
    n = B * T
    if targets is None:
        logits_p, _ = _bigram_pallas(idx.reshape(-1), None, table,
                                     tokens_per_tile=tokens_per_tile)
        # NOTE: perf-sensitive callers should keep the lane-padded (N, Vp)
        # logits and mask columns >= V instead of paying this slice's HBM pass.
        return logits_p[:n, :V].reshape(B, T, V), None
    logits_p, loss = _bigram_pallas(idx.reshape(-1), targets.reshape(-1), table,
                                    tokens_per_tile=tokens_per_tile)
    return logits_p[:n, :V], loss


if __name__ == "__main__":
    # Small deterministic setup: vocab of 65 chars, batch=2, seq=8.
    vocab_size = 65
    B, T = 2, 8

    key = jax.random.PRNGKey(0)
    k_table, k_idx, k_tgt = jax.random.split(key, 3)

    # nn.Embedding default init: N(0, 1).
    table = jax.random.normal(k_table, (vocab_size, vocab_size), dtype=jnp.float32)
    idx = jax.random.randint(k_idx, (B, T), 0, vocab_size, dtype=jnp.int32)
    targets = jax.random.randint(k_tgt, (B, T), 0, vocab_size, dtype=jnp.int32)

    logits, loss = bigram_forward(idx, targets, table)
    logits = jax.block_until_ready(logits)
    loss = jax.block_until_ready(loss)

    # Pure-JAX reference (embedding gather + mean cross-entropy).
    ref_logits = table[idx.reshape(-1)]                               # (B*T, V)
    ref_lse = jax.scipy.special.logsumexp(ref_logits, axis=-1)
    ref_tgt = jnp.take_along_axis(
        ref_logits, targets.reshape(-1, 1), axis=-1
    ).squeeze(-1)
    ref_loss = jnp.mean(ref_lse - ref_tgt)

    assert logits.shape == (B * T, vocab_size)
    assert np.allclose(np.asarray(logits), np.asarray(ref_logits), atol=1e-5)
    assert np.allclose(float(loss), float(ref_loss), atol=1e-5)

    # targets=None branch (logits only), mirroring the PyTorch module.
    logits3d, no_loss = bigram_forward(idx, None, table)
    logits3d = jax.block_until_ready(logits3d)
    assert no_loss is None and logits3d.shape == (B, T, vocab_size)
    assert np.allclose(np.asarray(logits3d.reshape(B * T, vocab_size)),
                       np.asarray(ref_logits), atol=1e-5)

    print("KERNEL_OK")
</pallas_src>

<mosaic_0001>
module attributes {stable_mosaic.version = 11 : i64} {
  func.func @_loss_kernel(%arg0: i32, %arg1: memref<16x1xi32, #tpu.memory_space<vmem>>, %arg2: memref<16x1xi32, #tpu.memory_space<vmem>>, %arg3: memref<3x128x128xbf16, #tpu.memory_space<vmem>>, %arg4: memref<16x128xf32, #tpu.memory_space<vmem>>, %arg5: memref<16x1xf32, #tpu.memory_space<vmem>>) attributes {dimension_semantics = [#tpu.dimension_semantics<parallel>], iteration_bounds = array<i64: 1>, scalar_prefetch = 0 : i64, scratch_operands = 0 : i64, tpu.core_type = #tpu.core_type<tc>, window_params = [{transform_indices = @transform_0, window_bounds = array<i64: 16, 1>}, {transform_indices = @transform_1, window_bounds = array<i64: 16, 1>}, {pipeline_mode = #tpu.pipeline_mode<synchronous>, transform_indices = @transform_2, window_bounds = array<i64: 3, 128, 128>}, {transform_indices = @transform_3, window_bounds = array<i64: 16, 128>}, {transform_indices = @transform_4, window_bounds = array<i64: 16, 1>}]} {
    %c0 = arith.constant 0 : index
    %c0_0 = arith.constant 0 : index
    %0 = vector.load %arg1[%c0, %c0_0] : memref<16x1xi32, #tpu.memory_space<vmem>>, vector<16x1xi32>
    %1 = tpu.iota {dimensions = array<i32: 1>} : vector<16x128xi32>
    %2 = vector.broadcast %0 : vector<16x1xi32> to vector<16x128xi32>
    %3 = arith.cmpi eq, %1, %2 : vector<16x128xi32>
    %cst = arith.constant 1.000000e+00 : f32
    %cst_1 = arith.constant 0.000000e+00 : f32
    %4 = vector.broadcast %cst : f32 to vector<16x128xf32>
    %5 = vector.broadcast %cst_1 : f32 to vector<16x128xf32>
    %6 = arith.select %3, %4, %5 : vector<16x128xi1>, vector<16x128xf32>
    %7 = arith.truncf %6 : vector<16x128xf32> to vector<16x128xbf16>
    %c0_2 = arith.constant 0 : index
    %c0_3 = arith.constant 0 : index
    %c0_4 = arith.constant 0 : index
    %8 = vector.load %arg3[%c0_2, %c0_3, %c0_4] : memref<3x128x128xbf16, #tpu.memory_space<vmem>>, vector<1x128x128xbf16>
    %9 = vector.shape_cast %8 : vector<1x128x128xbf16> to vector<128x128xbf16>
    %cst_5 = arith.constant dense<0.000000e+00> : vector<16x128xf32>
    %10 = tpu.matmul %7, %9, %cst_5 {dimension_numbers = #tpu.dot_dimension_numbers<[1], [0], [0], [1], [0, 0, 1, 1], [], []>} : vector<16x128xbf16>, vector<128x128xbf16>, vector<16x128xf32> -> vector<16x128xf32>
    %c1 = arith.constant 1 : index
    %c0_6 = arith.constant 0 : index
    %c0_7 = arith.constant 0 : index
    %11 = vector.load %arg3[%c1, %c0_6, %c0_7] : memref<3x128x128xbf16, #tpu.memory_space<vmem>>, vector<1x128x128xbf16>
    %12 = vector.shape_cast %11 : vector<1x128x128xbf16> to vector<128x128xbf16>
    %cst_8 = arith.constant dense<0.000000e+00> : vector<16x128xf32>
    %13 = tpu.matmul %7, %12, %cst_8 {dimension_numbers = #tpu.dot_dimension_numbers<[1], [0], [0], [1], [0, 0, 1, 1], [], []>} : vector<16x128xbf16>, vector<128x128xbf16>, vector<16x128xf32> -> vector<16x128xf32>
    %14 = arith.addf %10, %13 : vector<16x128xf32>
    %c2 = arith.constant 2 : index
    %c0_9 = arith.constant 0 : index
    %c0_10 = arith.constant 0 : index
    %15 = vector.load %arg3[%c2, %c0_9, %c0_10] : memref<3x128x128xbf16, #tpu.memory_space<vmem>>, vector<1x128x128xbf16>
    %16 = vector.shape_cast %15 : vector<1x128x128xbf16> to vector<128x128xbf16>
    %cst_11 = arith.constant dense<0.000000e+00> : vector<16x128xf32>
    %17 = tpu.matmul %7, %16, %cst_11 {dimension_numbers = #tpu.dot_dimension_numbers<[1], [0], [0], [1], [0, 0, 1, 1], [], []>} : vector<16x128xbf16>, vector<128x128xbf16>, vector<16x128xf32> -> vector<16x128xf32>
    %18 = arith.addf %14, %17 : vector<16x128xf32>
    %c0_12 = arith.constant 0 : index
    %c0_13 = arith.constant 0 : index
    %19 = vector.load %arg4[%c0_12, %c0_13] : memref<16x128xf32, #tpu.memory_space<vmem>>, vector<16x128xf32>
    tpu.vector_store %arg4[%c0_12, %c0_13], %18 {strides = array<i32>} : memref<16x128xf32, #tpu.memory_space<vmem>>, vector<16x128xf32>,
    %20 = tpu.iota {dimensions = array<i32: 1>} : vector<16x128xi32>
    %c65_i32 = arith.constant 65 : i32
    %21 = vector.broadcast %c65_i32 : i32 to vector<16x128xi32>
    %22 = arith.cmpi slt, %20, %21 : vector<16x128xi32>
    %cst_14 = arith.constant -1.000000e+30 : f32
    %23 = vector.broadcast %cst_14 : f32 to vector<16x128xf32>
    %24 = arith.select %22, %18, %23 : vector<16x128xi1>, vector<16x128xf32>
    %cst_15 = arith.constant dense<0xFF800000> : vector<16xf32>
    %25 = vector.multi_reduction <maximumf>, %24, %cst_15 [1] : vector<16x128xf32> to vector<16xf32>
    %26 = vector.shape_cast %25 : vector<16xf32> to vector<16x1xf32>
    %27 = vector.broadcast %26 : vector<16x1xf32> to vector<16x128xf32>
    %28 = arith.subf %24, %27 : vector<16x128xf32>
    %29 = math.exp %28 : vector<16x128xf32>
    %cst_16 = arith.constant dense<0.000000e+00> : vector<16xf32>
    %30 = vector.multi_reduction <add>, %29, %cst_16 [1] : vector<16x128xf32> to vector<16xf32>
    %31 = vector.shape_cast %30 : vector<16xf32> to vector<16x1xf32>
    %32 = math.log %31 : vector<16x1xf32>
    %33 = arith.addf %32, %26 : vector<16x1xf32>
    %c0_17 = arith.constant 0 : index
    %c0_18 = arith.constant 0 : index
    %34 = vector.load %arg2[%c0_17, %c0_18] : memref<16x1xi32, #tpu.memory_space<vmem>>, vector<16x1xi32>
    %35 = vector.broadcast %34 : vector<16x1xi32> to vector<16x128xi32>
    %36 = arith.cmpi eq, %20, %35 : vector<16x128xi32>
    %cst_19 = arith.constant 0.000000e+00 : f32
    %37 = vector.broadcast %cst_19 : f32 to vector<16x128xf32>
    %38 = arith.select %36, %18, %37 : vector<16x128xi1>, vector<16x128xf32>
    %cst_20 = arith.constant dense<0.000000e+00> : vector<16xf32>
    %39 = vector.multi_reduction <add>, %38, %cst_20 [1] : vector<16x128xf32> to vector<16xf32>
    %40 = vector.shape_cast %39 : vector<16xf32> to vector<16x1xf32>
    %c16_i32 = arith.constant 16 : i32
    %41 = arith.muli %arg0, %c16_i32 : i32
    %42 = tpu.iota {dimensions = array<i32: 0>} : vector<16x1xi32>
    %43 = vector.broadcast %41 : i32 to vector<16x1xi32>
    %44 = arith.addi %43, %42 : vector<16x1xi32>
    %c16_i32_21 = arith.constant 16 : i32
    %45 = vector.broadcast %c16_i32_21 : i32 to vector<16x1xi32>
    %46 = arith.cmpi slt, %44, %45 : vector<16x1xi32>
    %47 = arith.extui %46 : vector<16x1xi1> to vector<16x1xi32>
    %48 = arith.sitofp %47 : vector<16x1xi32> to vector<16x1xf32>
    %49 = arith.subf %33, %40 : vector<16x1xf32>
    %50 = arith.mulf %48, %49 : vector<16x1xf32>
    %c0_22 = arith.constant 0 : index
    %c0_23 = arith.constant 0 : index
    %51 = vector.load %arg5[%c0_22, %c0_23] : memref<16x1xf32, #tpu.memory_space<vmem>>, vector<16x1xf32>
    tpu.vector_store %arg5[%c0_22, %c0_23], %50 {strides = array<i32>} : memref<16x1xf32, #tpu.memory_space<vmem>>, vector<16x1xf32>,
    return
  }
  func.func @transform_0(%arg0: i32) -> (i32, i32) {
    %c0_i32 = arith.constant 0 : i32
    %c0_i32_0 = arith.constant 0 : i32
    return %arg0, %c0_i32 : i32, i32
  }
  func.func @transform_1(%arg0: i32) -> (i32, i32) {
    %c0_i32 = arith.constant 0 : i32
    %c0_i32_0 = arith.constant 0 : i32
    return %arg0, %c0_i32 : i32, i32
  }
  func.func @transform_2(%arg0: i32) -> (i32, i32, i32) {
    %c0_i32 = arith.constant 0 : i32
    %c0_i32_0 = arith.constant 0 : i32
    %c0_i32_1 = arith.constant 0 : i32
    %c0_i32_2 = arith.constant 0 : i32
    return %c0_i32, %c0_i32_0, %c0_i32_1 : i32, i32, i32
  }
  func.func @transform_3(%arg0: i32) -> (i32, i32) {
    %c0_i32 = arith.constant 0 : i32
    %c0_i32_0 = arith.constant 0 : i32
    return %arg0, %c0_i32 : i32, i32
  }
  func.func @transform_4(%arg0: i32) -> (i32, i32) {
    %c0_i32 = arith.constant 0 : i32
    %c0_i32_0 = arith.constant 0 : i32
    return %arg0, %c0_i32 : i32, i32
  }
}

</mosaic_0001>

<bundles_post_ra>
// kernel: tpu_custom_call.1
= control target key start
LH: loop header
LB: loop body
LE: loop exit
PB: predicated region body
PF: predicated region fallthrough
CT: control target
= control target key end

     0   :  { %10 = vsyncpa [#allocation3], 0  ;;  %s941_s0 = inlined_call_operand.hbm [shape: s32[16,1], index: 0, kind: input, shape index: {}]   ;;  %s942_s1 = inlined_call_operand.hbm [shape: s32[16,1], index: 1, kind: input, shape index: {}]   ;;  %s943_s2 = inlined_call_operand.hbm [shape: bf16[3,128,128], index: 2, kind: input, shape index: {}]   ;;  %s944_s3 = inlined_call_operand.hbm [shape: f32[16,128], index: 3, kind: output, shape index: {0}]   ;;  %s945_s4 = inlined_call_operand.hbm [shape: f32[16,1], index: 4, kind: output, shape index: {1}]  }
   0x1   :  { %11 = vsyncpa [#allocation6], 0 }
   0x2   :  { %12 = vsyncpa [#allocation4], 0 }
   0x3   :  { %13 = vsyncpa [#allocation10], 0  ;;  %s777_s15 = smov [#allocation5]   ;;  %s778_s17 = smov [#allocation2]  }
   0x4   :  { %s31_s16 = sshll.u32 %s777_s15, 4  ;;  %s19_s18 = sshll.u32 %s778_s17, 4  ;;  %s32_s16 = int_to_ptr.vmem [resolvable:$true] %s31_s16  ;;  %s815_s18 = int_to_ptr.vmem [resolvable:$true] %s19_s18 }
   0x5   :  { %s659_s21 = scalar_lea.hbm %s942_s1, 256 }
   0x6   :  { %p660_p0 = scmp.ne.s32.totalorder %s942_s1, %s659_s21  ;;  %p663_p1 = scmp.lt.u32.totalorder %s659_s21, %s942_s1 }
   0x8   :  { %p665_p2 = pnand %p663_p1, %p660_p0 }
   0xa   :  { %668 = shalt.err (!%p665_p2)
}
   0xb   :  { %s669_s26 = scalar_lea.vmem %s32_s16, 256  ;;  %p674_p4 = scmp.lt.s32.totalorder %s32_s16, %s32_s16 }
   0xc   :  { %p670_p3 = scmp.ne.s32.totalorder %s32_s16, %s669_s26  ;;  %p675_p5 = scmp.lt.s32.totalorder %s669_s26, %s669_s26 }
   0xe   :  { %p676_p6 = por %p675_p5, %p674_p4 }
  0x10   :  { %p677_p7 = pnand %p676_p6, %p670_p3 }
  0x12   :  { %680 = shalt.err (!%p677_p7)
}
  0x13   :  { %s779_s27 = smov 128   ;;  %s780_s28 = smov 8  }
  0x14   :  { %37 = dma.hbm_to_vmem [thread:$0]  %s942_s1, 256, %s32_s16, [#allocation6], %s779_s27, %s779_s27, %s780_s28  }
  0x15   :  { %s681_s7 = scalar_lea.hbm %s941_s0, 256 }
  0x16   :  { %p682_p8 = scmp.ne.s32.totalorder %s941_s0, %s681_s7  ;;  %p685_p9 = scmp.lt.u32.totalorder %s681_s7, %s941_s0 }
  0x18   :  { %p687_p10 = pnand %p685_p9, %p682_p8 }
  0x1a   :  { %690 = shalt.err (!%p687_p10)
}
  0x1b   :  { %s691_s12 = scalar_lea.vmem %s815_s18, 256  ;;  %p696_p12 = scmp.lt.s32.totalorder %s815_s18, %s815_s18 }
  0x1c   :  { %p692_p11 = scmp.ne.s32.totalorder %s815_s18, %s691_s12  ;;  %p697_p13 = scmp.lt.s32.totalorder %s691_s12, %s691_s12 }
  0x1e   :  { %p698_p0 = por %p697_p13, %p696_p12 }
  0x20   :  { %p699_p1 = pnand %p698_p0, %p692_p11 }
  0x22   :  { %702 = shalt.err (!%p699_p1)
}
  0x23   :  { %25 = dma.hbm_to_vmem [thread:$0]  %s941_s0, 256, %s815_s18, [#allocation3], %s779_s27, %s779_s27, %s780_s28  }
  0x24   :  { %s781_s14 = smov [#allocation7]   ;;  %s703_s19 = scalar_lea.hbm %s943_s2, 3072 }
  0x25   :  { %s43_s15 = sshll.u32 %s781_s14, 4  ;;  %p704_p2 = scmp.ne.s32.totalorder %s943_s2, %s703_s19  ;;  %s44_s15 = int_to_ptr.vmem [resolvable:$true] %s43_s15 }
  0x26   :  { %p707_p3 = scmp.lt.u32.totalorder %s703_s19, %s943_s2 }
  0x28   :  { %p709_p4 = pnand %p707_p3, %p704_p2 }
  0x2a   :  { %712 = shalt.err (!%p709_p4)
}
  0x2b   :  { %s713_s24 = scalar_lea.vmem %s44_s15, 3072  ;;  %p718_p6 = scmp.lt.s32.totalorder %s44_s15, %s44_s15 }
  0x2c   :  { %p714_p5 = scmp.ne.s32.totalorder %s44_s15, %s713_s24  ;;  %p719_p7 = scmp.lt.s32.totalorder %s713_s24, %s713_s24 }
  0x2e   :  { %p720_p8 = por %p719_p7, %p718_p6 }
  0x30   :  { %p721_p9 = pnand %p720_p8, %p714_p5 }
  0x32   :  { %724 = shalt.err (!%p721_p9)
}
  0x33   :  { %s782_s0 = smov 64   ;;  %s783_s18 = smov 4  }
  0x34   :  { %49 = dma.hbm_to_vmem [thread:$0]  %s943_s2, 3072, %s44_s15, [#allocation6], %s782_s0, %s782_s0, %s783_s18  }
  0x35   :  { %769 = dma.done.wait [#allocation3], 256  }
  0x36   :  { %770 = vsyncadd [#allocation3], 4294967040 }
  0x37   :  { %771 = dma.done.wait [#allocation6], 3328  }
  0x38   :  { %772 = vsyncadd [#allocation6], 4294963968  ;;  %v784_v0 = vmov 0   ;;  %v785_v1 = vmov 0.0   ;;  %v60_v2 = vld [vmem:[#allocation2] sm:$0xff]  ;;  %v61_v3 = vld [vmem:[#allocation2 + $0x8] sm:$0xff]  ;;  %v62_v21 = vlaneseq }
  0x39   :  { %625 = vset.pattern.permute.xlu0 %v784_v0  ;;  %566 = vmatprep.subr.bf16.mxu0 %v785_v1  ;;  %v627_v4 = vld [vmem:[#allocation7] sm:$0xff]   ;;  %v629_v6 = vld [vmem:[#allocation7 + $0x8] sm:$0xff]   ;;  %v419_v8 = vld [vmem:[#allocation5] sm:$0xff]  ;;  %vm786_vm0 = vmmov 0   ;;  %v787_v27 = vmov 1.0|1.0  }
  0x3a   :  { %546 = vmatprep.subr.bf16.mxu1 %v785_v1  ;;  %626 = vset.pattern.permute.xlu1 %v784_v0  ;;  %v628_v5 = vld [vmem:[#allocation7 + $0x40] sm:$0xff]   ;;  %v630_v7 = vld [vmem:[#allocation7 + $0x48] sm:$0xff]   ;;  %v631_v9 = vld [vmem:[#allocation7 + $0x10] sm:$0xff]   ;;  %v885_v23 = vand.u32 127, %v62_v21  ;;  %s788_s2 = smov [#allocation8]  }
  0x3b   :  { %65 = vperm.xlu0 %625, %v60_v2   ;;  %567 = vmatpush3.bf16.msra.mxu0 %v627_v4  ;;  %v632_v10 = vld [vmem:[#allocation7 + $0x50] sm:$0xff]   ;;  %v633_v11 = vld [vmem:[#allocation7 + $0x18] sm:$0xff]   ;;  %v635_v13 = vld [vmem:[#allocation7 + $0x20] sm:$0xff]   ;;  %s460_s29 = sshll.u32 %s788_s2, 4  ;;  %s461_s29 = int_to_ptr.vmem [resolvable:$true] %s460_s29 }
  0x3c   :  { %547 = vmatpush3.bf16.msra.mxu1 %v628_v5  ;;  %568 = vmatprep.subr.bf16.mxu0 %v785_v1  ;;  %v634_v12 = vld [vmem:[#allocation7 + $0x58] sm:$0xff]   ;;  %v636_v14 = vld [vmem:[#allocation7 + $0x60] sm:$0xff]   ;;  %v637_v15 = vld [vmem:[#allocation7 + $0x28] sm:$0xff]   ;;  %vm396_vm4 = vcmp.lt.s32.totalorder %v885_v23, 65  ;;  %s725_s30 = scalar_lea.vmem %s461_s29, 256  ;;  %p730_p11 = scmp.lt.s32.totalorder %s461_s29, %s461_s29 }
  0x3d   :  { %548 = vmatprep.subr.bf16.mxu1 %v785_v1  ;;  %562 = vmatprep.mubr.msk.bf16.mxu1 %vm786_vm0, %v785_v1  ;;  %v638_v16 = vld [vmem:[#allocation7 + $0x68] sm:$0xff]   ;;  %v639_v17 = vld [vmem:[#allocation7 + $0x30] sm:$0xff]   ;;  %v641_v19 = vld [vmem:[#allocation7 + $0x38] sm:$0xff]   ;;  %p726_p10 = scmp.ne.s32.totalorder %s461_s29, %s725_s30  ;;  %p731_p12 = scmp.lt.s32.totalorder %s725_s30, %s725_s30 }
  0x3e   :  { %582 = vmatprep.mubr.msk.bf16.mxu0 %vm786_vm0, %v785_v1  ;;  %v640_v18 = vld [vmem:[#allocation7 + $0x70] sm:$0xff]   ;;  %v642_v20 = vld [vmem:[#allocation7 + $0x78] sm:$0xff]   ;;  %v643_v25 = vld [vmem:[#allocation7 + $0x80] sm:$0xff]  }
  0x3f   :  { %68 = vperm.xlu0 %625, %v61_v3   ;;  %569 = vmatpush3.bf16.msra.mxu0 %v629_v6  ;;  %v644_v28 = vld [vmem:[#allocation7 + $0x88] sm:$0xff]   ;;  %v645_v29 = vld [vmem:[#allocation7 + $0x90] sm:$0xff]   ;;  %v646_v30 = vld [vmem:[#allocation7 + $0x98] sm:$0xff]   ;;  %p732_p13 = por %p731_p12, %p730_p11 }
  0x40   :  { %549 = vmatpush3.bf16.msra.mxu1 %v630_v7  ;;  %570 = vmatprep.subr.bf16.mxu0 %v785_v1  ;;  %v647_v31 = vld [vmem:[#allocation7 + $0xa0] sm:$0xff]   ;;  %v648_v32 = vld [vmem:[#allocation7 + $0xa8] sm:$0xff]   ;;  %v649_v33 = vld [vmem:[#allocation7 + $0xb0] sm:$0xff]  }
  0x41   :  { %550 = vmatprep.subr.bf16.mxu1 %v785_v1  ;;  %v650_v34 = vld [vmem:[#allocation7 + $0xb8] sm:$0xff]   ;;  %p733_p0 = pnand %p732_p13, %p726_p10 }
  0x42   :  { %v420_v47 = vld [vmem:[#allocation5 + $0x8] sm:$0xff] }
  0x43   :  { %422 = vperm.xlu0 %625, %v419_v8   ;;  %571 = vmatpush3.bf16.msra.mxu0 %v631_v9 }
  0x44   :  { %551 = vmatpush3.bf16.msra.mxu1 %v632_v10  ;;  %572 = vmatprep.subr.bf16.mxu0 %v785_v1 }
  0x45   :  { %552 = vmatprep.subr.bf16.mxu1 %v785_v1 }
  0x47   :  { %573 = vmatpush3.bf16.msra.mxu0 %v633_v11 }
  0x48   :  { %553 = vmatpush3.bf16.msra.mxu1 %v634_v12  ;;  %574 = vmatprep.subr.bf16.mxu0 %v785_v1 }
  0x49   :  { %554 = vmatprep.subr.bf16.mxu1 %v785_v1 }
  0x4b   :  { %575 = vmatpush3.bf16.msra.mxu0 %v635_v13 }
  0x4c   :  { %555 = vmatpush3.bf16.msra.mxu1 %v636_v14  ;;  %576 = vmatprep.subr.bf16.mxu0 %v785_v1 }
  0x4d   :  { %556 = vmatprep.subr.bf16.mxu1 %v785_v1 }
  0x4f   :  { %577 = vmatpush3.bf16.msra.mxu0 %v637_v15 }
  0x50   :  { %557 = vmatpush3.bf16.msra.mxu1 %v638_v16  ;;  %578 = vmatprep.subr.bf16.mxu0 %v785_v1 }
  0x51   :  { %558 = vmatprep.subr.bf16.mxu1 %v785_v1 }
  0x53   :  { %579 = vmatpush3.bf16.msra.mxu0 %v639_v17 }
  0x54   :  { %559 = vmatpush3.bf16.msra.mxu1 %v640_v18  ;;  %580 = vmatprep.subr.bf16.mxu0 %v785_v1 }
  0x55   :  { %560 = vmatprep.subr.bf16.mxu1 %v785_v1 }
  0x57   :  { %581 = vmatpush3.bf16.msra.mxu0 %v641_v19 }
  0x58   :  { %561 = vmatpush3.bf16.msra.mxu1 %v642_v20  ;;  %586 = vmatprep.subr.bf16.mxu0 %v785_v1 }
  0xba   :  { %v66_v22 = vpop.permute.xlu0 %65 }
  0xbb   :  { %vm70_vm1 = vcmp.eq.s32.totalorder %v885_v23, %v66_v22 }
  0xbe   :  { %v69_v24 = vpop.permute.xlu0 %68 }
  0xbf   :  { %vm71_vm2 = vcmp.eq.s32.totalorder %v885_v23, %v69_v24 }
  0xc0   :  { %vm889_vm3 = vmpackc.low %vm71_vm2, %vm70_vm1 }
  0xc1   :  { %563 = vmatmul.mubr.msk.bf16.vlgmr.msra.gmra.mrb[0].mxu1 %vm889_vm3, %v787_v27  ;;  %583 = vmatmul.mubr.msk.bf16.vlgmr.msra.gmra.mrb[0].mxu0 %vm889_vm3, %v787_v27 }
  0xc2   :  { %587 = vmatpush3.bf16.msra.mxu0 %v643_v25  ;;  %602 = vmatprep.mubr.msk.bf16.mxu0 %vm786_vm0, %v785_v1  ;;  %v423_v55 = vpop.permute.xlu0 %422 }
  0xc3   :  { %588 = vmatprep.subr.bf16.mxu0 %v785_v1  ;;  %vm427_vm5 = vcmp.eq.s32.totalorder %v885_v23, %v423_v55 }
  0xc6   :  { %589 = vmatpush3.bf16.msra.mxu0 %v644_v28 }
  0xc7   :  { %590 = vmatprep.subr.bf16.mxu0 %v785_v1 }
  0xca   :  { %591 = vmatpush3.bf16.msra.mxu0 %v645_v29 }
  0xcb   :  { %592 = vmatprep.subr.bf16.mxu0 %v785_v1 }
  0xce   :  { %593 = vmatpush3.bf16.msra.mxu0 %v646_v30 }
  0xcf   :  { %594 = vmatprep.subr.bf16.mxu0 %v785_v1 }
  0xd2   :  { %595 = vmatpush3.bf16.msra.mxu0 %v647_v31 }
  0xd3   :  { %596 = vmatprep.subr.bf16.mxu0 %v785_v1 }
  0xd6   :  { %597 = vmatpush3.bf16.msra.mxu0 %v648_v32 }
  0xd7   :  { %598 = vmatprep.subr.bf16.mxu0 %v785_v1 }
  0xda   :  { %599 = vmatpush3.bf16.msra.mxu0 %v649_v33 }
  0xdb   :  { %600 = vmatprep.subr.bf16.mxu0 %v785_v1 }
  0xde   :  { %601 = vmatpush3.bf16.msra.mxu0 %v650_v34 }
  0xe1   :  { %603 = vmatmul.mubr.msk.bf16.vlgmr.msra.gmra.mrb[0].mxu0 %vm889_vm3, %v787_v27 }
 0x194   :  { %v190_v35 = vpop.f32.mrb[0].mxu1 }
 0x195   :  { %v564_v36 = vpop.f32.mrb[1].mxu1 }
 0x196   :  { %v193_v37 = vpop.f32.mrb[2].mxu1 }
 0x197   :  { %v565_v38 = vpop.f32.mrb[3].mxu1 }
 0x1b4   :  { %v385_v39 = vpop.f32.mrb[0].mxu0 }
 0x1b5   :  { %v606_v40 = vadd.f32 %v385_v39, %v190_v35  ;;  %v604_v41 = vpop.f32.mrb[1].mxu0 }
 0x1b6   :  { %v388_v42 = vpop.f32.mrb[2].mxu0 }
 0x1b7   :  { %394 = vst [vmem:[#allocation8] sm:$0xff] %v606_v40  ;;  %v607_v43 = vadd.f32 %v388_v42, %v193_v37  ;;  %v605_v44 = vpop.f32.mrb[3].mxu0  ;;  %v397_v45 = vsel %vm396_vm4, %v606_v40, -1e+30  ;;  %v429_v58 = vsel %vm427_vm5, %v606_v40, 0.0 }
 0x1b8   :  { %399 = vmax.xlane.f32.xlu1 %v397_v45 }
 0x1b9   :  { %395 = vst [vmem:[#allocation8 + $0x8] sm:$0xff] %v607_v43  ;;  %v398_v46 = vsel %vm396_vm4, %v607_v43, -1e+30 }
 0x1bc   :  { %401 = vmax.xlane.f32.xlu1 %v398_v46 }
 0x1cd   :  { %425 = vperm.xlu1 %626, %v420_v47  }
 0x245   :  { %v400_v48 = vpop.xlane.xlu1 %399 }
 0x246   :  { %v403_v49 = vsub.f32 %v397_v45, %v400_v48 }
 0x248   :  { %v405_v50 = vmul.f32 1.442695, %v403_v49 }
 0x249   :  { %v402_v51 = vpop.xlane.xlu1 %401 }
 0x24a   :  { %651 = vpow2.f32 %v405_v50  ;;  %v404_v52 = vsub.f32 %v398_v46, %v402_v51 }
 0x24c   :  { %v407_v53 = vmul.f32 1.442695, %v404_v52 }
 0x24d   :  { %v426_v56 = vpop.permute.xlu1 %425 }
 0x24e   :  { %653 = vpow2.f32 %v407_v53  ;;  %vm428_vm6 = vcmp.eq.s32.totalorder %v885_v23, %v426_v56 }
 0x24f   :  { %v430_v59 = vsel %vm428_vm6, %v607_v43, 0.0 }
 0x254   :  { %v652_v54 = vpop.eup %651 }
 0x255   :  { %409 = vadd.xlane.f32.xlu0 %v652_v54 }
 0x258   :  { %v654_v57 = vpop.eup %653 }
 0x259   :  { %411 = vadd.xlane.f32.xlu1 %v654_v57  ;;  %431 = vadd.xlane.f32.xlu0 %v429_v58 }
 0x25d   :  { %433 = vadd.xlane.f32.xlu0 %v430_v59 }
 0x25e   :  { %736 = shalt.err (!%p733_p0)
}
 0x25f   :  { %s737_s7 = scalar_lea.hbm %s944_s3, 256 }
 0x260   :  { %p738_p1 = scmp.ne.s32.totalorder %s944_s3, %s737_s7  ;;  %p741_p2 = scmp.lt.u32.totalorder %s737_s7, %s944_s3 }
 0x262   :  { %p743_p3 = pnand %p741_p2, %p738_p1 }
 0x264   :  { %746 = shalt.err (!%p743_p3)
}
 0x265   :  { %466 = dma.vmem_to_hbm [thread:$0]  %s461_s29, 256, %s944_s3, [#allocation4], %s779_s27, %s779_s27, %s780_s28   ;;  %vm452_vm7 = vcmask 7168  }
 0x266   :  { %s789_s13 = smov [#allocation9]  }
 0x267   :  { %s472_s14 = sshll.u32 %s789_s13, 4  ;;  %s473_s14 = int_to_ptr.vmem [resolvable:$true] %s472_s14 }
 0x268   :  { %s747_s3 = scalar_lea.vmem %s473_s14, 256  ;;  %p752_p5 = scmp.lt.s32.totalorder %s473_s14, %s473_s14 }
 0x269   :  { %p748_p4 = scmp.ne.s32.totalorder %s473_s14, %s747_s3  ;;  %p753_p6 = scmp.lt.s32.totalorder %s747_s3, %s747_s3 }
 0x26b   :  { %p754_p7 = por %p753_p6, %p752_p5 }
 0x26d   :  { %p755_p8 = pnand %p754_p7, %p748_p4 }
 0x2e2   :  { %v410_v60 = vpop.xlane.xlu0 %409 }
 0x2e3   :  { %655 = vlog2.f32 %v410_v60 }
 0x2e6   :  { %v412_v61 = vpop.xlane.xlu1 %411  ;;  %v432_v0 = vpop.xlane.xlu0 %431 }
 0x2e7   :  { %657 = vlog2.f32 %v412_v61 }
 0x2ea   :  { %v434_v6 = vpop.xlane.xlu0 %433 }
 0x2ed   :  { %v656_v62 = vpop.eup %655 }
 0x2ee   :  { %v414_v63 = vmul.f32 0.6931472, %v656_v62 }
 0x2f0   :  { %v417_v1 = vadd.f32 %v414_v63, %v400_v48 }
 0x2f1   :  { %v658_v2 = vpop.eup %657 }
 0x2f2   :  { %v416_v3 = vmul.f32 0.6931472, %v658_v2  ;;  %v448_v4 = vsub.f32 %v417_v1, %v432_v0 }
 0x2f4   :  { %v418_v5 = vadd.f32 %v416_v3, %v402_v51  ;;  %453 = vst.msk [vmem:[#allocation9] sm:$0xff] %vm452_vm7, %v448_v4 }
 0x2f6   :  { %v449_v7 = vsub.f32 %v418_v5, %v434_v6 }
 0x2f8   :  { %454 = vst.msk [vmem:[#allocation9 + $0x8] sm:$0xff] %vm452_vm7, %v449_v7 }
 0x2f9   :  { %758 = shalt.err (!%p755_p8)
}
 0x2fa   :  { %s759_s17 = scalar_lea.hbm %s945_s4, 256 }
 0x2fb   :  { %p760_p9 = scmp.ne.s32.totalorder %s945_s4, %s759_s17  ;;  %p763_p10 = scmp.lt.u32.totalorder %s759_s17, %s945_s4 }
 0x2fd   :  { %p765_p11 = pnand %p763_p10, %p760_p9 }
 0x2ff   :  { %768 = shalt.err (!%p765_p11)
}
 0x300   :  { %478 = dma.vmem_to_hbm [thread:$0]  %s473_s14, 256, %s945_s4, [#allocation10], %s779_s27, %s779_s27, %s780_s28  }
 0x301   :  { %773 = dma.done.wait [#allocation4], 256  }
 0x302   :  { %774 = vsyncadd [#allocation4], 4294967040 }
 0x303   :  { %775 = dma.done.wait [#allocation10], 256  }
 0x304   :  { %776 = vsyncadd [#allocation10], 4294967040 }
 0x305   :  { %485 = vsyncpa [#allocation3], 1 }
 0x306   :  { %486 = vsyncpa [#allocation6], 1 }
 0x307   :  { %487 = vsyncpa [#allocation4], 1 }
 0x308   :  { %488 = vsyncpa [#allocation10], 1 }

</bundles_post_ra>
